<compile_context>
chip_gen: v7x
topology: tpu7x:2x2x1
jax: 0.10.0
libtpu: 0.0.40
codegen_flags: <defaults>
</compile_context>

<pallas_src>
import functools

import jax
import jax.numpy as jnp
from jax.experimental import pallas as pl
from jax.experimental.pallas import tpu as pltpu

# ---- model hyper-parameters (small, consistent with the module) ------------
BATCH = 8
INPUT_DIM = 64
HIDDEN_DIM = 32
LATENT_DIM = 32     # unused by forward math (kept for parity with __init__)
NUM_ENC = 7
NUM_DEC = 5

BIAS_LANES = 128                       # lane width of the packed bias slab
OUT_LANES = max(2 * HIDDEN_DIM, INPUT_DIM)   # lane width of the (2, H, .) stack


def _flvae_kernel(num_enc, num_dec, din, h_dim,
                  x_ref,       # (TB, Din)            f32
                  w_in_ref,    # (Din, H)             bf16   encoder layer 0
                  w_mid_ref,   # (nEm+nDm, H, H)      bf16   enc mid then dec mid
                  w_out_ref,   # (2, H, OUT_LANES)    bf16   [0]=enc head, [1]=dec last
                  bias_ref,    # (num_enc+num_dec, BIAS_LANES) f32, zero padded
                  out_ref):    # (TB, Din + 2H)       f32    packed [recon | head]
    H = h_dim
    n_mid_enc = num_enc - 2
    n_mid_dec = num_dec - 1

    def bias(idx, width):
        # offset-0 lane slice of the packed slab -> (1, width) f32
        return bias_ref[idx:idx + 1, :width]

    def mxu(a_f32, w_bf16):
        # bf16 MXU operands, f32 accumulation; elementwise stays f32.
        return jnp.dot(a_f32.astype(jnp.bfloat16), w_bf16,
                       preferred_element_type=jnp.float32)

    # ---- encode ---- (F.normalize(x) is discarded in the reference; dropout
    # is identity in eval, so the encoder input is x.)
    h = jnp.tanh(mxu(x_ref[...], w_in_ref[...]) + bias(0, H))
    for i in range(n_mid_enc):                       # Python-unrolled
        h = jnp.tanh(mxu(h, w_mid_ref[i]) + bias(1 + i, H))

    # Fused mu/logvar head: single (H, 2H) dot.
    w_head = w_out_ref[0]
    head = mxu(h, w_head[:, :2 * H]) + bias(1 + n_mid_enc, 2 * H)

    # ---- reparameterize (eval mode): z = mu = head[:, :H] (offset-0 slice) ----
    z = head[:, :H]

    # ---- decode ----
    for i in range(n_mid_dec):                       # Python-unrolled
        z = jnp.tanh(mxu(z, w_mid_ref[n_mid_enc + i]) + bias(2 + n_mid_enc + i, H))
    w_last = w_out_ref[1]
    recon = mxu(z, w_last[:, :din]) + bias(2 + n_mid_enc + n_mid_dec, din)

    # ---- single lane-dense packed store: aligned 64|64 merge [recon | head] ----
    out_ref[...] = jnp.concatenate([recon, head], axis=-1)


def flvae_forward(x, packed_params, *, row_tile=512):
    """FLVAE forward in one Pallas kernel. Returns (recon, mu, logvar)."""
    w_in, w_mid, w_out, biases = packed_params
    B, Din = x.shape
    H = w_in.shape[1]

    # Row tiling: at small batch this is a single grid step; at large batch the
    # "parallel" axis shards rows across TensorCores (v7x) and keeps weights
    # VMEM-resident across steps (constant index_maps).
    TB = B if (B <= row_tile or B % row_tile != 0) else row_tile
    grid = (pl.cdiv(B, TB),)

    kernel = functools.partial(_flvae_kernel, NUM_ENC, NUM_DEC, Din, H)
    out_w = Din + 2 * H
    out_shape = jax.ShapeDtypeStruct((B, out_w), jnp.float32)

    # Advisory cost estimate so XLA's scheduler treats this call as cheap.
    flops = 2 * B * (
        Din * H                      # encoder layer 0
        + (NUM_ENC - 2) * H * H      # encoder mid layers
        + H * (2 * H)                # fused mu/logvar head
        + (NUM_DEC - 1) * H * H      # decoder mid layers
        + H * Din                    # decoder last
    )
    transcendentals = B * H * ((NUM_ENC - 1) + (NUM_DEC - 1))
    bytes_accessed = (
        int(x.size) * 4
        + (int(w_in.size) + int(w_mid.size) + int(w_out.size)) * 2   # bf16
        + int(biases.size) * 4
        + B * out_w * 4
    )
    cost = pl.CostEstimate(flops=flops, transcendentals=transcendentals,
                           bytes_accessed=bytes_accessed)

    packed_out = pl.pallas_call(
        kernel,
        out_shape=out_shape,
        grid_spec=pltpu.PrefetchScalarGridSpec(
            num_scalar_prefetch=0,
            grid=grid,
            in_specs=[
                pl.BlockSpec((TB, Din), lambda i: (i, 0)),            # x (row-tiled)
                pl.BlockSpec(w_in.shape, lambda i: (0, 0)),           # resident
                pl.BlockSpec(w_mid.shape, lambda i: (0, 0, 0)),       # resident
                pl.BlockSpec(w_out.shape, lambda i: (0, 0, 0)),       # resident
                pl.BlockSpec(biases.shape, lambda i: (0, 0)),         # resident
            ],
            out_specs=pl.BlockSpec((TB, out_w), lambda i: (i, 0)),
        ),
        compiler_params=pltpu.CompilerParams(
            dimension_semantics=("parallel",)),
        cost_estimate=cost,
    )(x, w_in, w_mid, w_out, biases)

    recon = packed_out[:, :Din]
    mu = packed_out[:, Din:Din + H]
    logvar = packed_out[:, Din + H:]
    return recon, mu, logvar


# --------------------------- parameter handling ------------------------------
def init_raw_params(key):
    """Per-layer (W, b), W stored as (in, out) f32, matching FLVAE.init_weights."""
    def linear(k, fan_in, fan_out):
        kw, kb = jax.random.split(k)
        std = jnp.sqrt(2.0 / (fan_in + fan_out))
        w = (jax.random.normal(kw, (fan_out, fan_in), jnp.float32) * std).T
        b = jax.random.normal(kb, (1, fan_out), jnp.float32) * 0.001
        return w, b

    keys = jax.random.split(key, NUM_ENC + NUM_DEC)
    ki = iter(keys)

    enc = [linear(next(ki), INPUT_DIM, HIDDEN_DIM)]
    for _ in range(NUM_ENC - 2):
        enc.append(linear(next(ki), HIDDEN_DIM, HIDDEN_DIM))
    enc.append(linear(next(ki), HIDDEN_DIM, 2 * HIDDEN_DIM))

    dec = []
    for _ in range(NUM_DEC - 1):
        dec.append(linear(next(ki), HIDDEN_DIM, HIDDEN_DIM))
    dec.append(linear(next(ki), HIDDEN_DIM, INPUT_DIM))
    return enc, dec


def pack_params(enc, dec):
    """Pack per-layer params into 4 kernel operands (bf16 weights, f32 biases)."""
    H, Din = HIDDEN_DIM, INPUT_DIM
    assert max(Din, 2 * H) <= BIAS_LANES

    w_in = enc[0][0].astype(jnp.bfloat16)                                   # (Din, H)
    mids = [w for (w, _) in enc[1:-1]] + [w for (w, _) in dec[:-1]]
    w_mid = jnp.stack(mids).astype(jnp.bfloat16)                            # (9, H, H)

    def pad_lanes(w, lanes):
        return jnp.pad(w, ((0, 0), (0, lanes - w.shape[1])))

    w_head = pad_lanes(enc[-1][0], OUT_LANES)                               # (H, 64)
    w_last = pad_lanes(dec[-1][0], OUT_LANES)                               # (H, 64)
    w_out = jnp.stack([w_head, w_last]).astype(jnp.bfloat16)                # (2, H, 64)

    biases = jnp.zeros((NUM_ENC + NUM_DEC, BIAS_LANES), jnp.float32)
    all_b = [b for (_, b) in enc] + [b for (_, b) in dec]
    for idx, b in enumerate(all_b):
        biases = biases.at[idx, :b.shape[1]].set(b[0])
    return (w_in, w_mid, w_out, biases)


# ------------------------------ references -----------------------------------
def _reference_forward_f32(x, enc, dec):
    """Pure-JAX f32 reference with the PyTorch module's eval-mode semantics."""
    h = x                                   # F.normalize(x) discarded; dropout = identity
    for i, (w, b) in enumerate(enc):
        h = h @ w + b
        if i != len(enc) - 1:
            h = jnp.tanh(h)
    mu, logvar = h[:, :HIDDEN_DIM], h[:, HIDDEN_DIM:]
    z = mu
    for i, (w, b) in enumerate(dec):
        z = z @ w + b
        if i != len(dec) - 1:
            z = jnp.tanh(z)
    return z, mu, logvar


def _reference_forward_bf16(x, packed_params):
    """Pure-JAX reference mirroring the kernel's bf16-operand / f32-accum math."""
    w_in, w_mid, w_out, biases = packed_params
    H, Din = HIDDEN_DIM, INPUT_DIM
    n_me, n_md = NUM_ENC - 2, NUM_DEC - 1

    def mxu(a, w):
        return jnp.dot(a.astype(jnp.bfloat16), w, preferred_element_type=jnp.float32)

    h = jnp.tanh(mxu(x, w_in) + biases[0:1, :H])
    for i in range(n_me):
        h = jnp.tanh(mxu(h, w_mid[i]) + biases[1 + i:2 + i, :H])
    head = mxu(h, w_out[0, :, :2 * H]) + biases[NUM_ENC - 1:NUM_ENC, :2 * H]
    mu, logvar = head[:, :H], head[:, H:]
    z = mu
    for i in range(n_md):
        z = jnp.tanh(mxu(z, w_mid[n_me + i]) + biases[NUM_ENC + i:NUM_ENC + i + 1, :H])
    recon = mxu(z, w_out[1, :, :Din]) + biases[NUM_ENC + NUM_DEC - 1:NUM_ENC + NUM_DEC, :Din]
    return recon, mu, logvar


if __name__ == "__main__":
    key = jax.random.PRNGKey(0)
    kx, kp = jax.random.split(key)
    x = jax.random.normal(kx, (BATCH, INPUT_DIM), jnp.float32)

    enc, dec = init_raw_params(kp)
    packed_params = pack_params(enc, dec)

    recon, mu, logvar = flvae_forward(x, packed_params)
    jax.block_until_ready((recon, mu, logvar))

    # Tight check against a reference that mirrors the kernel's bf16-MXU math.
    r_b, m_b, l_b = _reference_forward_bf16(x, packed_params)
    assert jnp.allclose(recon, r_b, atol=1e-2, rtol=1e-2)
    assert jnp.allclose(mu, m_b, atol=1e-2, rtol=1e-2)
    assert jnp.allclose(logvar, l_b, atol=1e-2, rtol=1e-2)

    # Loose semantic check against the full-f32 PyTorch-faithful reference
    # (tolerance accounts for bf16 weight/activation quantization on the MXU).
    r_f, m_f, l_f = _reference_forward_f32(x, enc, dec)
    assert jnp.allclose(recon, r_f, atol=1e-1, rtol=1e-1)
    assert jnp.allclose(mu, m_f, atol=1e-1, rtol=1e-1)
    assert jnp.allclose(logvar, l_f, atol=1e-1, rtol=1e-1)

    print("KERNEL_OK")
</pallas_src>

<mosaic_0001>
module attributes {stable_mosaic.version = 11 : i64} {
  func.func @_flvae_kernel(%arg0: i32, %arg1: memref<8x64xf32, #tpu.memory_space<vmem>>, %arg2: memref<64x32xbf16, #tpu.memory_space<vmem>>, %arg3: memref<9x32x32xbf16, #tpu.memory_space<vmem>>, %arg4: memref<2x32x64xbf16, #tpu.memory_space<vmem>>, %arg5: memref<12x128xf32, #tpu.memory_space<vmem>>, %arg6: memref<8x128xf32, #tpu.memory_space<vmem>>) attributes {dimension_semantics = [#tpu.dimension_semantics<parallel>], iteration_bounds = array<i64: 1>, scalar_prefetch = 0 : i64, scratch_operands = 0 : i64, tpu.core_type = #tpu.core_type<tc>, window_params = [{transform_indices = @transform_0, window_bounds = array<i64: 8, 64>}, {pipeline_mode = #tpu.pipeline_mode<synchronous>, transform_indices = @transform_1, window_bounds = array<i64: 64, 32>}, {pipeline_mode = #tpu.pipeline_mode<synchronous>, transform_indices = @transform_2, window_bounds = array<i64: 9, 32, 32>}, {pipeline_mode = #tpu.pipeline_mode<synchronous>, transform_indices = @transform_3, window_bounds = array<i64: 2, 32, 64>}, {pipeline_mode = #tpu.pipeline_mode<synchronous>, transform_indices = @transform_4, window_bounds = array<i64: 12, 128>}, {transform_indices = @transform_5, window_bounds = array<i64: 8, 128>}]} {
    %c0 = arith.constant 0 : index
    %c0_0 = arith.constant 0 : index
    %0 = vector.load %arg1[%c0, %c0_0] : memref<8x64xf32, #tpu.memory_space<vmem>>, vector<8x64xf32>
    %c0_1 = arith.constant 0 : index
    %c0_2 = arith.constant 0 : index
    %1 = vector.load %arg2[%c0_1, %c0_2] : memref<64x32xbf16, #tpu.memory_space<vmem>>, vector<64x32xbf16>
    %2 = arith.truncf %0 : vector<8x64xf32> to vector<8x64xbf16>
    %cst = arith.constant dense<0.000000e+00> : vector<8x32xf32>
    %3 = tpu.matmul %2, %1, %cst {dimension_numbers = #tpu.dot_dimension_numbers<[1], [0], [0], [1], [0, 0, 1, 1], [], []>} : vector<8x64xbf16>, vector<64x32xbf16>, vector<8x32xf32> -> vector<8x32xf32>
    %c0_3 = arith.constant 0 : index
    %c0_4 = arith.constant 0 : index
    %4 = vector.load %arg5[%c0_3, %c0_4] : memref<12x128xf32, #tpu.memory_space<vmem>>, vector<1x32xf32>
    %5 = vector.broadcast %4 : vector<1x32xf32> to vector<8x32xf32>
    %6 = arith.addf %3, %5 : vector<8x32xf32>
    %7 = math.tanh %6 : vector<8x32xf32>
    %c0_5 = arith.constant 0 : index
    %c0_6 = arith.constant 0 : index
    %c0_7 = arith.constant 0 : index
    %8 = vector.load %arg3[%c0_5, %c0_6, %c0_7] : memref<9x32x32xbf16, #tpu.memory_space<vmem>>, vector<1x32x32xbf16>
    %9 = vector.shape_cast %8 : vector<1x32x32xbf16> to vector<32x32xbf16>
    %10 = arith.truncf %7 : vector<8x32xf32> to vector<8x32xbf16>
    %cst_8 = arith.constant dense<0.000000e+00> : vector<8x32xf32>
    %11 = tpu.matmul %10, %9, %cst_8 {dimension_numbers = #tpu.dot_dimension_numbers<[1], [0], [0], [1], [0, 0, 1, 1], [], []>} : vector<8x32xbf16>, vector<32x32xbf16>, vector<8x32xf32> -> vector<8x32xf32>
    %c1 = arith.constant 1 : index
    %c0_9 = arith.constant 0 : index
    %12 = vector.load %arg5[%c1, %c0_9] : memref<12x128xf32, #tpu.memory_space<vmem>>, vector<1x32xf32>
    %13 = vector.broadcast %12 : vector<1x32xf32> to vector<8x32xf32>
    %14 = arith.addf %11, %13 : vector<8x32xf32>
    %15 = math.tanh %14 : vector<8x32xf32>
    %c1_10 = arith.constant 1 : index
    %c0_11 = arith.constant 0 : index
    %c0_12 = arith.constant 0 : index
    %16 = vector.load %arg3[%c1_10, %c0_11, %c0_12] : memref<9x32x32xbf16, #tpu.memory_space<vmem>>, vector<1x32x32xbf16>
    %17 = vector.shape_cast %16 : vector<1x32x32xbf16> to vector<32x32xbf16>
    %18 = arith.truncf %15 : vector<8x32xf32> to vector<8x32xbf16>
    %cst_13 = arith.constant dense<0.000000e+00> : vector<8x32xf32>
    %19 = tpu.matmul %18, %17, %cst_13 {dimension_numbers = #tpu.dot_dimension_numbers<[1], [0], [0], [1], [0, 0, 1, 1], [], []>} : vector<8x32xbf16>, vector<32x32xbf16>, vector<8x32xf32> -> vector<8x32xf32>
    %c2 = arith.constant 2 : index
    %c0_14 = arith.constant 0 : index
    %20 = vector.load %arg5[%c2, %c0_14] : memref<12x128xf32, #tpu.memory_space<vmem>>, vector<1x32xf32>
    %21 = vector.broadcast %20 : vector<1x32xf32> to vector<8x32xf32>
    %22 = arith.addf %19, %21 : vector<8x32xf32>
    %23 = math.tanh %22 : vector<8x32xf32>
    %c2_15 = arith.constant 2 : index
    %c0_16 = arith.constant 0 : index
    %c0_17 = arith.constant 0 : index
    %24 = vector.load %arg3[%c2_15, %c0_16, %c0_17] : memref<9x32x32xbf16, #tpu.memory_space<vmem>>, vector<1x32x32xbf16>
    %25 = vector.shape_cast %24 : vector<1x32x32xbf16> to vector<32x32xbf16>
    %26 = arith.truncf %23 : vector<8x32xf32> to vector<8x32xbf16>
    %cst_18 = arith.constant dense<0.000000e+00> : vector<8x32xf32>
    %27 = tpu.matmul %26, %25, %cst_18 {dimension_numbers = #tpu.dot_dimension_numbers<[1], [0], [0], [1], [0, 0, 1, 1], [], []>} : vector<8x32xbf16>, vector<32x32xbf16>, vector<8x32xf32> -> vector<8x32xf32>
    %c3 = arith.constant 3 : index
    %c0_19 = arith.constant 0 : index
    %28 = vector.load %arg5[%c3, %c0_19] : memref<12x128xf32, #tpu.memory_space<vmem>>, vector<1x32xf32>
    %29 = vector.broadcast %28 : vector<1x32xf32> to vector<8x32xf32>
    %30 = arith.addf %27, %29 : vector<8x32xf32>
    %31 = math.tanh %30 : vector<8x32xf32>
    %c3_20 = arith.constant 3 : index
    %c0_21 = arith.constant 0 : index
    %c0_22 = arith.constant 0 : index
    %32 = vector.load %arg3[%c3_20, %c0_21, %c0_22] : memref<9x32x32xbf16, #tpu.memory_space<vmem>>, vector<1x32x32xbf16>
    %33 = vector.shape_cast %32 : vector<1x32x32xbf16> to vector<32x32xbf16>
    %34 = arith.truncf %31 : vector<8x32xf32> to vector<8x32xbf16>
    %cst_23 = arith.constant dense<0.000000e+00> : vector<8x32xf32>
    %35 = tpu.matmul %34, %33, %cst_23 {dimension_numbers = #tpu.dot_dimension_numbers<[1], [0], [0], [1], [0, 0, 1, 1], [], []>} : vector<8x32xbf16>, vector<32x32xbf16>, vector<8x32xf32> -> vector<8x32xf32>
    %c4 = arith.constant 4 : index
    %c0_24 = arith.constant 0 : index
    %36 = vector.load %arg5[%c4, %c0_24] : memref<12x128xf32, #tpu.memory_space<vmem>>, vector<1x32xf32>
    %37 = vector.broadcast %36 : vector<1x32xf32> to vector<8x32xf32>
    %38 = arith.addf %35, %37 : vector<8x32xf32>
    %39 = math.tanh %38 : vector<8x32xf32>
    %c4_25 = arith.constant 4 : index
    %c0_26 = arith.constant 0 : index
    %c0_27 = arith.constant 0 : index
    %40 = vector.load %arg3[%c4_25, %c0_26, %c0_27] : memref<9x32x32xbf16, #tpu.memory_space<vmem>>, vector<1x32x32xbf16>
    %41 = vector.shape_cast %40 : vector<1x32x32xbf16> to vector<32x32xbf16>
    %42 = arith.truncf %39 : vector<8x32xf32> to vector<8x32xbf16>
    %cst_28 = arith.constant dense<0.000000e+00> : vector<8x32xf32>
    %43 = tpu.matmul %42, %41, %cst_28 {dimension_numbers = #tpu.dot_dimension_numbers<[1], [0], [0], [1], [0, 0, 1, 1], [], []>} : vector<8x32xbf16>, vector<32x32xbf16>, vector<8x32xf32> -> vector<8x32xf32>
    %c5 = arith.constant 5 : index
    %c0_29 = arith.constant 0 : index
    %44 = vector.load %arg5[%c5, %c0_29] : memref<12x128xf32, #tpu.memory_space<vmem>>, vector<1x32xf32>
    %45 = vector.broadcast %44 : vector<1x32xf32> to vector<8x32xf32>
    %46 = arith.addf %43, %45 : vector<8x32xf32>
    %47 = math.tanh %46 : vector<8x32xf32>
    %c0_30 = arith.constant 0 : index
    %c0_31 = arith.constant 0 : index
    %c0_32 = arith.constant 0 : index
    %48 = vector.load %arg4[%c0_30, %c0_31, %c0_32] : memref<2x32x64xbf16, #tpu.memory_space<vmem>>, vector<1x32x64xbf16>
    %49 = vector.shape_cast %48 : vector<1x32x64xbf16> to vector<32x64xbf16>
    %50 = arith.truncf %47 : vector<8x32xf32> to vector<8x32xbf16>
    %cst_33 = arith.constant dense<0.000000e+00> : vector<8x64xf32>
    %51 = tpu.matmul %50, %49, %cst_33 {dimension_numbers = #tpu.dot_dimension_numbers<[1], [0], [0], [1], [0, 0, 1, 1], [], []>} : vector<8x32xbf16>, vector<32x64xbf16>, vector<8x64xf32> -> vector<8x64xf32>
    %c6 = arith.constant 6 : index
    %c0_34 = arith.constant 0 : index
    %52 = vector.load %arg5[%c6, %c0_34] : memref<12x128xf32, #tpu.memory_space<vmem>>, vector<1x64xf32>
    %53 = vector.broadcast %52 : vector<1x64xf32> to vector<8x64xf32>
    %54 = arith.addf %51, %53 : vector<8x64xf32>
    %55 = vector.extract_strided_slice %54 {offsets = [0, 0], sizes = [8, 32], strides = [1, 1]} : vector<8x64xf32> to vector<8x32xf32>
    %c5_35 = arith.constant 5 : index
    %c0_36 = arith.constant 0 : index
    %c0_37 = arith.constant 0 : index
    %56 = vector.load %arg3[%c5_35, %c0_36, %c0_37] : memref<9x32x32xbf16, #tpu.memory_space<vmem>>, vector<1x32x32xbf16>
    %57 = vector.shape_cast %56 : vector<1x32x32xbf16> to vector<32x32xbf16>
    %58 = arith.truncf %55 : vector<8x32xf32> to vector<8x32xbf16>
    %cst_38 = arith.constant dense<0.000000e+00> : vector<8x32xf32>
    %59 = tpu.matmul %58, %57, %cst_38 {dimension_numbers = #tpu.dot_dimension_numbers<[1], [0], [0], [1], [0, 0, 1, 1], [], []>} : vector<8x32xbf16>, vector<32x32xbf16>, vector<8x32xf32> -> vector<8x32xf32>
    %c7 = arith.constant 7 : index
    %c0_39 = arith.constant 0 : index
    %60 = vector.load %arg5[%c7, %c0_39] : memref<12x128xf32, #tpu.memory_space<vmem>>, vector<1x32xf32>
    %61 = vector.broadcast %60 : vector<1x32xf32> to vector<8x32xf32>
    %62 = arith.addf %59, %61 : vector<8x32xf32>
    %63 = math.tanh %62 : vector<8x32xf32>
    %c6_40 = arith.constant 6 : index
    %c0_41 = arith.constant 0 : index
    %c0_42 = arith.constant 0 : index
    %64 = vector.load %arg3[%c6_40, %c0_41, %c0_42] : memref<9x32x32xbf16, #tpu.memory_space<vmem>>, vector<1x32x32xbf16>
    %65 = vector.shape_cast %64 : vector<1x32x32xbf16> to vector<32x32xbf16>
    %66 = arith.truncf %63 : vector<8x32xf32> to vector<8x32xbf16>
    %cst_43 = arith.constant dense<0.000000e+00> : vector<8x32xf32>
    %67 = tpu.matmul %66, %65, %cst_43 {dimension_numbers = #tpu.dot_dimension_numbers<[1], [0], [0], [1], [0, 0, 1, 1], [], []>} : vector<8x32xbf16>, vector<32x32xbf16>, vector<8x32xf32> -> vector<8x32xf32>
    %c8 = arith.constant 8 : index
    %c0_44 = arith.constant 0 : index
    %68 = vector.load %arg5[%c8, %c0_44] : memref<12x128xf32, #tpu.memory_space<vmem>>, vector<1x32xf32>
    %69 = vector.broadcast %68 : vector<1x32xf32> to vector<8x32xf32>
    %70 = arith.addf %67, %69 : vector<8x32xf32>
    %71 = math.tanh %70 : vector<8x32xf32>
    %c7_45 = arith.constant 7 : index
    %c0_46 = arith.constant 0 : index
    %c0_47 = arith.constant 0 : index
    %72 = vector.load %arg3[%c7_45, %c0_46, %c0_47] : memref<9x32x32xbf16, #tpu.memory_space<vmem>>, vector<1x32x32xbf16>
    %73 = vector.shape_cast %72 : vector<1x32x32xbf16> to vector<32x32xbf16>
    %74 = arith.truncf %71 : vector<8x32xf32> to vector<8x32xbf16>
    %cst_48 = arith.constant dense<0.000000e+00> : vector<8x32xf32>
    %75 = tpu.matmul %74, %73, %cst_48 {dimension_numbers = #tpu.dot_dimension_numbers<[1], [0], [0], [1], [0, 0, 1, 1], [], []>} : vector<8x32xbf16>, vector<32x32xbf16>, vector<8x32xf32> -> vector<8x32xf32>
    %c9 = arith.constant 9 : index
    %c0_49 = arith.constant 0 : index
    %76 = vector.load %arg5[%c9, %c0_49] : memref<12x128xf32, #tpu.memory_space<vmem>>, vector<1x32xf32>
    %77 = vector.broadcast %76 : vector<1x32xf32> to vector<8x32xf32>
    %78 = arith.addf %75, %77 : vector<8x32xf32>
    %79 = math.tanh %78 : vector<8x32xf32>
    %c8_50 = arith.constant 8 : index
    %c0_51 = arith.constant 0 : index
    %c0_52 = arith.constant 0 : index
    %80 = vector.load %arg3[%c8_50, %c0_51, %c0_52] : memref<9x32x32xbf16, #tpu.memory_space<vmem>>, vector<1x32x32xbf16>
    %81 = vector.shape_cast %80 : vector<1x32x32xbf16> to vector<32x32xbf16>
    %82 = arith.truncf %79 : vector<8x32xf32> to vector<8x32xbf16>
    %cst_53 = arith.constant dense<0.000000e+00> : vector<8x32xf32>
    %83 = tpu.matmul %82, %81, %cst_53 {dimension_numbers = #tpu.dot_dimension_numbers<[1], [0], [0], [1], [0, 0, 1, 1], [], []>} : vector<8x32xbf16>, vector<32x32xbf16>, vector<8x32xf32> -> vector<8x32xf32>
    %c10 = arith.constant 10 : index
    %c0_54 = arith.constant 0 : index
    %84 = vector.load %arg5[%c10, %c0_54] : memref<12x128xf32, #tpu.memory_space<vmem>>, vector<1x32xf32>
    %85 = vector.broadcast %84 : vector<1x32xf32> to vector<8x32xf32>
    %86 = arith.addf %83, %85 : vector<8x32xf32>
    %87 = math.tanh %86 : vector<8x32xf32>
    %c1_55 = arith.constant 1 : index
    %c0_56 = arith.constant 0 : index
    %c0_57 = arith.constant 0 : index
    %88 = vector.load %arg4[%c1_55, %c0_56, %c0_57] : memref<2x32x64xbf16, #tpu.memory_space<vmem>>, vector<1x32x64xbf16>
    %89 = vector.shape_cast %88 : vector<1x32x64xbf16> to vector<32x64xbf16>
    %90 = arith.truncf %87 : vector<8x32xf32> to vector<8x32xbf16>
    %cst_58 = arith.constant dense<0.000000e+00> : vector<8x64xf32>
    %91 = tpu.matmul %90, %89, %cst_58 {dimension_numbers = #tpu.dot_dimension_numbers<[1], [0], [0], [1], [0, 0, 1, 1], [], []>} : vector<8x32xbf16>, vector<32x64xbf16>, vector<8x64xf32> -> vector<8x64xf32>
    %c11 = arith.constant 11 : index
    %c0_59 = arith.constant 0 : index
    %92 = vector.load %arg5[%c11, %c0_59] : memref<12x128xf32, #tpu.memory_space<vmem>>, vector<1x64xf32>
    %93 = vector.broadcast %92 : vector<1x64xf32> to vector<8x64xf32>
    %94 = arith.addf %91, %93 : vector<8x64xf32>
    %95 = tpu.concatenate %94, %54 in 1 : vector<8x64xf32>, vector<8x64xf32> -> vector<8x128xf32>
    %c0_60 = arith.constant 0 : index
    %c0_61 = arith.constant 0 : index
    %96 = vector.load %arg6[%c0_60, %c0_61] : memref<8x128xf32, #tpu.memory_space<vmem>>, vector<8x128xf32>
    tpu.vector_store %arg6[%c0_60, %c0_61], %95 {strides = array<i32>} : memref<8x128xf32, #tpu.memory_space<vmem>>, vector<8x128xf32>,
    return
  }
  func.func @transform_0(%arg0: i32) -> (i32, i32) {
    %c0_i32 = arith.constant 0 : i32
    %c0_i32_0 = arith.constant 0 : i32
    return %arg0, %c0_i32 : i32, i32
  }
  func.func @transform_1(%arg0: i32) -> (i32, i32) {
    %c0_i32 = arith.constant 0 : i32
    %c0_i32_0 = arith.constant 0 : i32
    %c0_i32_1 = arith.constant 0 : i32
    return %c0_i32, %c0_i32_0 : i32, i32
  }
  func.func @transform_2(%arg0: i32) -> (i32, i32, i32) {
    %c0_i32 = arith.constant 0 : i32
    %c0_i32_0 = arith.constant 0 : i32
    %c0_i32_1 = arith.constant 0 : i32
    %c0_i32_2 = arith.constant 0 : i32
    return %c0_i32, %c0_i32_0, %c0_i32_1 : i32, i32, i32
  }
  func.func @transform_3(%arg0: i32) -> (i32, i32, i32) {
    %c0_i32 = arith.constant 0 : i32
    %c0_i32_0 = arith.constant 0 : i32
    %c0_i32_1 = arith.constant 0 : i32
    %c0_i32_2 = arith.constant 0 : i32
    return %c0_i32, %c0_i32_0, %c0_i32_1 : i32, i32, i32
  }
  func.func @transform_4(%arg0: i32) -> (i32, i32) {
    %c0_i32 = arith.constant 0 : i32
    %c0_i32_0 = arith.constant 0 : i32
    %c0_i32_1 = arith.constant 0 : i32
    return %c0_i32, %c0_i32_0 : i32, i32
  }
  func.func @transform_5(%arg0: i32) -> (i32, i32) {
    %c0_i32 = arith.constant 0 : i32
    %c0_i32_0 = arith.constant 0 : i32
    return %arg0, %c0_i32 : i32, i32
  }
}

</mosaic_0001>

<bundles_post_ra>
// kernel: tpu_custom_call.1
= control target key start
LH: loop header
LB: loop body
LE: loop exit
PB: predicated region body
PF: predicated region fallthrough
CT: control target
= control target key end

     0   :  { %10 = vsyncpa [#allocation3], 0  ;;  %s1356_s0 = inlined_call_operand.vmem [shape: f32[8,64], index: 0, kind: input, shape index: {}]   ;;  %s1357_s1 = inlined_call_operand.vmem [shape: bf16[64,32], index: 1, kind: input, shape index: {}]   ;;  %s1358_s2 = inlined_call_operand.hbm [shape: bf16[9,32,32], index: 2, kind: input, shape index: {}]   ;;  %s1359_s3 = inlined_call_operand.vmem [shape: bf16[2,32,64], index: 3, kind: input, shape index: {}]   ;;  %s1360_s4 = inlined_call_operand.vmem [shape: f32[12,128], index: 4, kind: input, shape index: {}]   ;;  %s1361_s5 = inlined_call_operand.hbm [shape: f32[8,128], index: 5, kind: output, shape index: {}]  }
   0x1   :  { %11 = vsyncpa [#allocation4], 0  ;;  %s1167_s18 = smov [#allocation2]   ;;  %s1119_s22 = scalar_lea.hbm %s1358_s2, 2304 }
   0x2   :  { %s21_s19 = sshll.u32 %s1167_s18, 4  ;;  %p1120_p0 = scmp.ne.s32.totalorder %s1358_s2, %s1119_s22  ;;  %s22_s19 = int_to_ptr.vmem [resolvable:$true] %s21_s19 }
   0x3   :  { %p1123_p1 = scmp.lt.u32.totalorder %s1119_s22, %s1358_s2 }
   0x5   :  { %p1125_p2 = pnand %p1123_p1, %p1120_p0 }
   0x7   :  { %1128 = shalt.err (!%p1125_p2)
}
   0x8   :  { %s1129_s27 = scalar_lea.vmem %s22_s19, 2304  ;;  %p1134_p4 = scmp.lt.s32.totalorder %s22_s19, %s22_s19 }
   0x9   :  { %p1130_p3 = scmp.ne.s32.totalorder %s22_s19, %s1129_s27  ;;  %p1135_p5 = scmp.lt.s32.totalorder %s1129_s27, %s1129_s27 }
   0xb   :  { %p1136_p6 = por %p1135_p5, %p1134_p4 }
   0xd   :  { %p1137_p7 = pnand %p1136_p6, %p1130_p3 }
   0xf   :  { %1140 = shalt.err (!%p1137_p7)
}
  0x10   :  { %s1168_s28 = smov 64   ;;  %s1169_s29 = smov 4  }
  0x11   :  { %27 = dma.hbm_to_vmem [thread:$0]  %s1358_s2, 2304, %s22_s19, [#allocation3], %s1168_s28, %s1168_s28, %s1169_s29  }
  0x12   :  { %1163 = dma.done.wait [#allocation3], 2304  }
  0x13   :  { %1164 = vsyncadd [#allocation3], 4294964992  ;;  %v1170_v0 = vmov 0.0   ;;  %vm1171_vm0 = vmmov 0   ;;  %v1073_v1 = vld [vmem:[%s1357_s1] sm:$0xff]   ;;  %v1074_v2 = vld [vmem:[%s1357_s1 + $0x8] sm:$0xff]  }
  0x14   :  { %967 = vmatprep.subr.bf16.mxu0 %v1170_v0  ;;  %975 = vmatprep.mubr.msk.bf16.mxu0 %vm1171_vm0, %v1170_v0  ;;  %v1075_v3 = vld [vmem:[%s1357_s1 + $0x10] sm:$0xff]   ;;  %vm75_vm1 = vcmask 523264   ;;  %v1076_v4 = vld [vmem:[%s1357_s1 + $0x18] sm:$0xff]   ;;  %v36_v5 = vld [vmem:[%s1356_s0] sm:$0xff]  ;;  %vm142_vm2 = vcmask 261120  }
  0x15   :  { %979 = vmatprep.subr.bf16.mxu1 %v1170_v0  ;;  %983 = vmatprep.mubr.msk.bf16.mxu1 %vm1171_vm0, %v1170_v0  ;;  %v45_v6 = vpack.c.bf16 %v36_v5, %v36_v5  ;;  %v1077_v7 = vld [vmem:[#allocation2] sm:$0xff]   ;;  %v1078_v8 = vld [vmem:[#allocation2 + $0x8] sm:$0xff]   ;;  %v1079_v17 = vld [vmem:[#allocation2 + $0x10] sm:$0xff]  }
  0x16   :  { %968 = vmatpush3.bf16.msra.mxu0 %v1073_v1  ;;  %980 = vmatpush3.bf16.msra.mxu1 %v1077_v7  ;;  %v875_v9 = vld [vmem:[%s1360_s4] ss:$0 sm:$0xff]  ;;  %v1080_v18 = vld [vmem:[#allocation2 + $0x18] sm:$0xff]   ;;  %v881_v19 = vld [vmem:[%s1360_s4 + $0x1] ss:$0 sm:$0xff] }
  0x17   :  { %969 = vmatprep.subr.bf16.mxu0 %v1170_v0  ;;  %981 = vmatprep.subr.bf16.mxu1 %v1170_v0  ;;  %v1081_v27 = vld [vmem:[#allocation2 + $0x20] sm:$0xff]   ;;  %v1082_v28 = vld [vmem:[#allocation2 + $0x28] sm:$0xff]   ;;  %v1083_v37 = vld [vmem:[#allocation2 + $0x30] sm:$0xff]  }
  0x18   :  { %v885_v29 = vld [vmem:[%s1360_s4 + $0x2] ss:$0 sm:$0xff]  ;;  %v1084_v38 = vld [vmem:[#allocation2 + $0x38] sm:$0xff]   ;;  %v889_v39 = vld [vmem:[%s1360_s4 + $0x3] ss:$0 sm:$0xff] }
  0x19   :  { %v1085_v47 = vld [vmem:[#allocation2 + $0x40] sm:$0xff]   ;;  %v1086_v48 = vld [vmem:[#allocation2 + $0x48] sm:$0xff]   ;;  %v1089_v59 = vld [vmem:[#allocation2 + $0x50] sm:$0xff]  }
  0x1a   :  { %970 = vmatpush3.bf16.msra.mxu0 %v1074_v2  ;;  %982 = vmatpush3.bf16.msra.mxu1 %v1078_v8  ;;  %v893_v49 = vld [vmem:[%s1360_s4 + $0x4] ss:$0 sm:$0xff]  ;;  %v1088_v58 = vld [vmem:[%s1359_s3 + $0x8] sm:$0xff]   ;;  %v897_v60 = vld [vmem:[%s1360_s4 + $0x5] ss:$0 sm:$0xff] }
  0x1b   :  { %971 = vmatprep.subr.bf16.mxu0 %v1170_v0  ;;  %987 = vmatprep.subr.bf16.mxu1 %v1170_v0  ;;  %v1087_v57 = vld [vmem:[%s1359_s3] sm:$0xff]   ;;  %v1090_v5 = vld [vmem:[#allocation2 + $0x58] sm:$0xff]  }
  0x1e   :  { %972 = vmatpush3.bf16.msra.mxu0 %v1075_v3 }
  0x1f   :  { %973 = vmatprep.subr.bf16.mxu0 %v1170_v0 }
  0x22   :  { %974 = vmatpush3.bf16.msra.mxu0 %v1076_v4 }
  0x23   :  { %995 = vmatprep.subr.bf16.mxu0 %v1170_v0 }
  0x25   :  { %976 = vmatmul.mubr.msk.bf16.vlgmr.msra.gmra.mrb[0].mxu0 %vm75_vm1, %v45_v6  ;;  %v901_v6 = vld [vmem:[%s1360_s4 + $0x6] ss:$0 sm:$0xff] }
  0x26   :  { %999 = vmatprep.mubr.msk.bf16.mxu0 %vm1171_vm0, %v1170_v0  ;;  %996 = vmatpush3.bf16.msra.mxu0 %v1081_v27 }
  0x27   :  { %997 = vmatprep.subr.bf16.mxu0 %v1170_v0 }
  0x2a   :  { %998 = vmatpush3.bf16.msra.mxu0 %v1082_v28 }
  0x2b   :  { %1011 = vmatprep.subr.bf16.mxu0 %v1170_v0 }
  0xf8   :  { %v113_v10 = vpop.f32.mrb[0].mxu0 }
  0xf9   :  { %v114_v11 = vadd.f32 %v875_v9, %v113_v10  ;;  %v977_v12 = vpop.f32.mrb[1].mxu0 }
  0xfa   :  { %v116_v13 = vpop.f32.mrb[2].mxu0 }
  0xfb   :  { %1099 = vtanh.f32 %v114_v11  ;;  %v978_v14 = vpop.f32.mrb[3].mxu0  ;;  %v1091_v13 = vld [vmem:[#allocation2 + $0x60] sm:$0xff]  }
  0xfc   :  { %v1092_v14 = vld [vmem:[#allocation2 + $0x68] sm:$0xff]  }
 0x105   :  { %v1100_v15 = vpop.eup %1099 }
 0x106   :  { %v124_v16 = vpack.c.bf16 %v1100_v15, %v1100_v15  ;;  %v905_v15 = vld [vmem:[%s1360_s4 + $0x7] ss:$0 sm:$0xff] }
 0x108   :  { %984 = vmatmul.mubr.msk.bf16.vlgmr.msra.gmra.mrb[0].mxu1 %vm142_vm2, %v124_v16 }
 0x109   :  { %991 = vmatprep.mubr.msk.bf16.mxu1 %vm1171_vm0, %v1170_v0  ;;  %988 = vmatpush3.bf16.msra.mxu1 %v1079_v17 }
 0x10a   :  { %989 = vmatprep.subr.bf16.mxu1 %v1170_v0 }
 0x10d   :  { %990 = vmatpush3.bf16.msra.mxu1 %v1080_v18 }
 0x10e   :  { %1003 = vmatprep.subr.bf16.mxu1 %v1170_v0 }
 0x1db   :  { %v180_v20 = vpop.f32.mrb[0].mxu1 }
 0x1dc   :  { %v181_v21 = vadd.f32 %v881_v19, %v180_v20  ;;  %v985_v22 = vpop.f32.mrb[1].mxu1 }
 0x1dd   :  { %v183_v23 = vpop.f32.mrb[2].mxu1 }
 0x1de   :  { %1101 = vtanh.f32 %v181_v21  ;;  %v986_v24 = vpop.f32.mrb[3].mxu1  ;;  %v1093_v23 = vld [vmem:[#allocation2 + $0x70] sm:$0xff]  }
 0x1df   :  { %v1094_v24 = vld [vmem:[#allocation2 + $0x78] sm:$0xff]  }
 0x1e8   :  { %v1102_v25 = vpop.eup %1101 }
 0x1e9   :  { %v192_v26 = vpack.c.bf16 %v1102_v25, %v1102_v25  ;;  %v909_v25 = vld [vmem:[%s1360_s4 + $0x8] ss:$0 sm:$0xff] }
 0x1eb   :  { %992 = vmatmul.mubr.msk.bf16.vlgmr.msra.gmra.mrb[4].mxu1 %vm142_vm2, %v192_v26 }
 0x1ec   :  { %1007 = vmatprep.mubr.msk.bf16.mxu1 %vm1171_vm0, %v1170_v0  ;;  %1004 = vmatpush3.bf16.msra.mxu1 %v1083_v37 }
 0x1ed   :  { %1005 = vmatprep.subr.bf16.mxu1 %v1170_v0 }
 0x1f0   :  { %1006 = vmatpush3.bf16.msra.mxu1 %v1084_v38 }
 0x1f1   :  { %1019 = vmatprep.subr.bf16.mxu1 %v1170_v0 }
 0x2be   :  { %v247_v30 = vpop.f32.mrb[4].mxu1 }
 0x2bf   :  { %v248_v31 = vadd.f32 %v885_v29, %v247_v30  ;;  %v993_v32 = vpop.f32.mrb[5].mxu1 }
 0x2c0   :  { %v250_v33 = vpop.f32.mrb[6].mxu1 }
 0x2c1   :  { %1103 = vtanh.f32 %v248_v31  ;;  %v994_v34 = vpop.f32.mrb[7].mxu1  ;;  %v1095_v33 = vld [vmem:[#allocation2 + $0x80] sm:$0xff]  }
 0x2c2   :  { %v1096_v34 = vld [vmem:[#allocation2 + $0x88] sm:$0xff]  }
 0x2cb   :  { %v1104_v35 = vpop.eup %1103 }
 0x2cc   :  { %v259_v36 = vpack.c.bf16 %v1104_v35, %v1104_v35  ;;  %v913_v35 = vld [vmem:[%s1360_s4 + $0x9] ss:$0 sm:$0xff] }
 0x2ce   :  { %1000 = vmatmul.mubr.msk.bf16.vlgmr.msra.gmra.mrb[4].mxu0 %vm142_vm2, %v259_v36 }
 0x2cf   :  { %1015 = vmatprep.mubr.msk.bf16.mxu0 %vm1171_vm0, %v1170_v0  ;;  %1012 = vmatpush3.bf16.msra.mxu0 %v1085_v47 }
 0x2d0   :  { %1013 = vmatprep.subr.bf16.mxu0 %v1170_v0 }
 0x2d3   :  { %1014 = vmatpush3.bf16.msra.mxu0 %v1086_v48 }
 0x2d4   :  { %1027 = vmatprep.subr.bf16.mxu0 %v1170_v0 }
 0x3a1   :  { %v314_v40 = vpop.f32.mrb[4].mxu0 }
 0x3a2   :  { %v315_v41 = vadd.f32 %v889_v39, %v314_v40  ;;  %v1001_v42 = vpop.f32.mrb[5].mxu0 }
 0x3a3   :  { %v317_v43 = vpop.f32.mrb[6].mxu0 }
 0x3a4   :  { %1105 = vtanh.f32 %v315_v41  ;;  %v1002_v44 = vpop.f32.mrb[7].mxu0  ;;  %v1097_v43 = vld [vmem:[%s1359_s3 + $0x10] sm:$0xff]  }
 0x3a5   :  { %v1098_v44 = vld [vmem:[%s1359_s3 + $0x18] sm:$0xff]   ;;  %s1172_s3 = smov [#allocation5]  }
 0x3a6   :  { %s866_s18 = sshll.u32 %s1172_s3, 4  ;;  %s867_s18 = int_to_ptr.vmem [resolvable:$true] %s866_s18 }
 0x3a7   :  { %s1141_s19 = scalar_lea.vmem %s867_s18, 128  ;;  %p1146_p9 = scmp.lt.s32.totalorder %s867_s18, %s867_s18 }
 0x3a8   :  { %p1142_p8 = scmp.ne.s32.totalorder %s867_s18, %s1141_s19  ;;  %p1147_p10 = scmp.lt.s32.totalorder %s1141_s19, %s1141_s19 }
 0x3aa   :  { %p1148_p11 = por %p1147_p10, %p1146_p9 }
 0x3ac   :  { %p1149_p12 = pnand %p1148_p11, %p1142_p8 }
 0x3ae   :  { %v1106_v45 = vpop.eup %1105 }
 0x3af   :  { %v326_v46 = vpack.c.bf16 %v1106_v45, %v1106_v45  ;;  %v917_v45 = vld [vmem:[%s1360_s4 + $0xa] ss:$0 sm:$0xff] }
 0x3b1   :  { %1008 = vmatmul.mubr.msk.bf16.vlgmr.msra.gmra.mrb[8].mxu1 %vm142_vm2, %v326_v46 }
 0x3b2   :  { %1023 = vmatprep.mubr.msk.bf16.mxu1 %vm1171_vm0, %v1170_v0  ;;  %1020 = vmatpush3.bf16.msra.mxu1 %v1087_v57 }
 0x3b3   :  { %1021 = vmatprep.subr.bf16.mxu1 %v1170_v0 }
 0x3b6   :  { %1022 = vmatpush3.bf16.msra.mxu1 %v1088_v58 }
 0x3b7   :  { %1035 = vmatprep.subr.bf16.mxu1 %v1170_v0 }
 0x484   :  { %v381_v50 = vpop.f32.mrb[8].mxu1 }
 0x485   :  { %v382_v51 = vadd.f32 %v893_v49, %v381_v50  ;;  %v1009_v52 = vpop.f32.mrb[9].mxu1 }
 0x486   :  { %v384_v53 = vpop.f32.mrb[10].mxu1 }
 0x487   :  { %1107 = vtanh.f32 %v382_v51  ;;  %v1010_v54 = vpop.f32.mrb[11].mxu1 }
 0x491   :  { %v1108_v55 = vpop.eup %1107 }
 0x492   :  { %v393_v56 = vpack.c.bf16 %v1108_v55, %v1108_v55 }
 0x494   :  { %1016 = vmatmul.mubr.msk.bf16.vlgmr.msra.gmra.mrb[8].mxu0 %vm142_vm2, %v393_v56 }
 0x495   :  { %1031 = vmatprep.mubr.msk.bf16.mxu0 %vm1171_vm0, %v1170_v0  ;;  %1028 = vmatpush3.bf16.msra.mxu0 %v1089_v59 }
 0x496   :  { %1029 = vmatprep.subr.bf16.mxu0 %v1170_v0 }
 0x499   :  { %1030 = vmatpush3.bf16.msra.mxu0 %v1090_v5 }
 0x49a   :  { %1043 = vmatprep.subr.bf16.mxu0 %v1170_v0 }
 0x567   :  { %v448_v61 = vpop.f32.mrb[8].mxu0 }
 0x568   :  { %v449_v62 = vadd.f32 %v897_v60, %v448_v61  ;;  %v1017_v63 = vpop.f32.mrb[9].mxu0 }
 0x569   :  { %v451_v1 = vpop.f32.mrb[10].mxu0 }
 0x56a   :  { %1109 = vtanh.f32 %v449_v62  ;;  %v1018_v2 = vpop.f32.mrb[11].mxu0 }
 0x574   :  { %v1110_v3 = vpop.eup %1109 }
 0x575   :  { %v459_v4 = vpack.c.bf16 %v1110_v3, %v1110_v3 }
 0x577   :  { %1024 = vmatmul.mubr.msk.bf16.vlgmr.msra.gmra.mrb[12].mxu1 %vm142_vm2, %v459_v4 }
 0x578   :  { %1039 = vmatprep.mubr.msk.bf16.mxu1 %vm1171_vm0, %v1170_v0  ;;  %1036 = vmatpush3.bf16.msra.mxu1 %v1091_v13 }
 0x579   :  { %1037 = vmatprep.subr.bf16.mxu1 %v1170_v0 }
 0x57c   :  { %1038 = vmatpush3.bf16.msra.mxu1 %v1092_v14 }
 0x57d   :  { %1051 = vmatprep.subr.bf16.mxu1 %v1170_v0 }
 0x64a   :  { %v514_v7 = vpop.f32.mrb[12].mxu1 }
 0x64b   :  { %v515_v8 = vadd.f32 %v901_v6, %v514_v7  ;;  %v1025_v9 = vpop.f32.mrb[13].mxu1 }
 0x64c   :  { %v517_v10 = vpop.f32.mrb[14].mxu1 }
 0x64d   :  { %v525_v11 = vpack.c.bf16 %v515_v8, %v515_v8  ;;  %v1026_v12 = vpop.f32.mrb[15].mxu1  ;;  %855 = vrot.lane.b32.xlu0 %v515_v8, %s1168_s28 }
 0x64f   :  { %1032 = vmatmul.mubr.msk.bf16.vlgmr.msra.gmra.mrb[12].mxu0 %vm142_vm2, %v525_v11 }
 0x650   :  { %1047 = vmatprep.mubr.msk.bf16.mxu0 %vm1171_vm0, %v1170_v0  ;;  %1044 = vmatpush3.bf16.msra.mxu0 %v1093_v23 }
 0x651   :  { %1045 = vmatprep.subr.bf16.mxu0 %v1170_v0 }
 0x654   :  { %1046 = vmatpush3.bf16.msra.mxu0 %v1094_v24 }
 0x655   :  { %1059 = vmatprep.subr.bf16.mxu0 %v1170_v0 }
 0x6bf   :  { %v856_v56 = vpop.permute.xlu0 %855 }
 0x722   :  { %v580_v16 = vpop.f32.mrb[12].mxu0 }
 0x723   :  { %v581_v17 = vadd.f32 %v905_v15, %v580_v16  ;;  %v1033_v18 = vpop.f32.mrb[13].mxu0 }
 0x724   :  { %v583_v19 = vpop.f32.mrb[14].mxu0 }
 0x725   :  { %1111 = vtanh.f32 %v581_v17  ;;  %v1034_v20 = vpop.f32.mrb[15].mxu0 }
 0x72f   :  { %v1112_v21 = vpop.eup %1111 }
 0x730   :  { %v592_v22 = vpack.c.bf16 %v1112_v21, %v1112_v21 }
 0x732   :  { %1040 = vmatmul.mubr.msk.bf16.vlgmr.msra.gmra.mrb[16].mxu1 %vm142_vm2, %v592_v22 }
 0x733   :  { %1055 = vmatprep.mubr.msk.bf16.mxu1 %vm1171_vm0, %v1170_v0  ;;  %1052 = vmatpush3.bf16.msra.mxu1 %v1095_v33 }
 0x734   :  { %1053 = vmatprep.subr.bf16.mxu1 %v1170_v0 }
 0x737   :  { %1054 = vmatpush3.bf16.msra.mxu1 %v1096_v34 }
 0x805   :  { %v647_v26 = vpop.f32.mrb[16].mxu1 }
 0x806   :  { %v648_v27 = vadd.f32 %v909_v25, %v647_v26  ;;  %v1041_v28 = vpop.f32.mrb[17].mxu1 }
 0x807   :  { %v650_v29 = vpop.f32.mrb[18].mxu1 }
 0x808   :  { %1113 = vtanh.f32 %v648_v27  ;;  %v1042_v30 = vpop.f32.mrb[19].mxu1 }
 0x812   :  { %v1114_v31 = vpop.eup %1113 }
 0x813   :  { %v659_v32 = vpack.c.bf16 %v1114_v31, %v1114_v31 }
 0x815   :  { %1048 = vmatmul.mubr.msk.bf16.vlgmr.msra.gmra.mrb[16].mxu0 %vm142_vm2, %v659_v32 }
 0x816   :  { %1063 = vmatprep.mubr.msk.bf16.mxu0 %vm1171_vm0, %v1170_v0  ;;  %1060 = vmatpush3.bf16.msra.mxu0 %v1097_v43 }
 0x817   :  { %1061 = vmatprep.subr.bf16.mxu0 %v1170_v0  ;;  %v925_v0 = vld [vmem:[%s1360_s4 + $0xb] ss:$0 sm:$0xff] }
 0x81a   :  { %1062 = vmatpush3.bf16.msra.mxu0 %v1098_v44 }
 0x8e8   :  { %v714_v36 = vpop.f32.mrb[16].mxu0 }
 0x8e9   :  { %v715_v37 = vadd.f32 %v913_v35, %v714_v36  ;;  %v1049_v38 = vpop.f32.mrb[17].mxu0 }
 0x8ea   :  { %v717_v39 = vpop.f32.mrb[18].mxu0 }
 0x8eb   :  { %1115 = vtanh.f32 %v715_v37  ;;  %v1050_v40 = vpop.f32.mrb[19].mxu0 }
 0x8f5   :  { %v1116_v41 = vpop.eup %1115 }
 0x8f6   :  { %v726_v42 = vpack.c.bf16 %v1116_v41, %v1116_v41 }
 0x8f8   :  { %1056 = vmatmul.mubr.msk.bf16.vlgmr.msra.gmra.mrb[20].mxu1 %vm142_vm2, %v726_v42 }
 0x9cb   :  { %v781_v46 = vpop.f32.mrb[20].mxu1 }
 0x9cc   :  { %v782_v47 = vadd.f32 %v917_v45, %v781_v46  ;;  %v1057_v48 = vpop.f32.mrb[21].mxu1 }
 0x9cd   :  { %v784_v49 = vpop.f32.mrb[22].mxu1 }
 0x9ce   :  { %1117 = vtanh.f32 %v782_v47  ;;  %v1058_v50 = vpop.f32.mrb[23].mxu1 }
 0x9d8   :  { %v1118_v51 = vpop.eup %1117 }
 0x9d9   :  { %v793_v52 = vpack.c.bf16 %v1118_v51, %v1118_v51 }
 0x9db   :  { %1064 = vmatmul.mubr.msk.bf16.vlgmr.msra.gmra.mrb[20].mxu0 %vm142_vm2, %v793_v52 }
 0xaae   :  { %v848_v53 = vpop.f32.mrb[20].mxu0 }
 0xaaf   :  { %v849_v54 = vadd.f32 %v925_v0, %v848_v53  ;;  %v1065_v55 = vpop.f32.mrb[21].mxu0 }
 0xab0   :  { %v851_v57 = vpop.f32.mrb[22].mxu0 }
 0xab1   :  { %v1066_v58 = vpop.f32.mrb[23].mxu0  ;;  %v858_v59 = vsel %vm75_vm1, %v849_v54, %v856_v56 }
 0xab2   :  { %859 = vst [vmem:[#allocation5] sm:$0xff] %v858_v59 }
 0xab3   :  { %1152 = shalt.err (!%p1149_p12)
}
 0xab4   :  { %s1153_s21 = scalar_lea.hbm %s1361_s5, 128 }
 0xab5   :  { %p1154_p13 = scmp.ne.s32.totalorder %s1361_s5, %s1153_s21  ;;  %p1157_p0 = scmp.lt.u32.totalorder %s1153_s21, %s1361_s5 }
 0xab7   :  { %p1159_p1 = pnand %p1157_p0, %p1154_p13 }
 0xab9   :  { %1162 = shalt.err (!%p1159_p1)
}
 0xaba   :  { %869 = dma.vmem_to_hbm [thread:$0]  %s867_s18, 128, %s1361_s5, [#allocation4]  }
 0xabb   :  { %1165 = dma.done.wait [#allocation4], 128  }
 0xabc   :  { %1166 = vsyncadd [#allocation4], 4294967168 }
 0xabd   :  { %873 = vsyncpa [#allocation3], 1 }
 0xabe   :  { %874 = vsyncpa [#allocation4], 1 }

</bundles_post_ra>
